<compile_context>
chip_gen: v6e
topology: v6e:2x2x1
jax: 0.10.0
libtpu: 0.0.40
codegen_flags: <defaults>
</compile_context>

<pallas_src>
import math
from typing import NamedTuple

import jax
import jax.numpy as jnp
from jax.experimental import pallas as pl
from jax.experimental.pallas import tpu as pltpu


def _fused_up_proj_kernel(x_ref, w_ref, b_ref, o_ref):
    # x_ref: (TN, Hp)   w_ref: (Hp, TJ)   b_ref: (1, TJ) f32   o_ref: (TN, TJ)
    acc = jnp.dot(x_ref[...], w_ref[...], preferred_element_type=jnp.float32)
    o_ref[...] = (acc + b_ref[...]).astype(o_ref.dtype)


class FusedUpProjection(NamedTuple):
    w: jax.Array        # (Hp, Hp) block-diagonal fused weight, compute dtype
    b: jax.Array        # (1, Hp)  f32 fused bias
    hidden_size: int    # H
    rows_per_pack: int  # R (Hp = R * H)


def _choose_pack(h, compute_dtype):
    """Pick R rows per lane-dense packed row (Hp = R*H).

    Prefer Hp a multiple of 128 (unmasked stores) and cap Hp at 256 (f32) / 512 (bf16)
    so the block-diagonal MXU redundancy stays hidden under HBM on every generation.
    """
    max_hp = 512 if jnp.dtype(compute_dtype) == jnp.dtype(jnp.bfloat16) else 256
    if h >= max_hp:
        return 1, h
    lane_step = 128 // math.gcd(h, 128)            # smallest R with (R*H) % 128 == 0
    r = (max_hp // h // lane_step) * lane_step      # widest such R within the budget
    if r < 1:
        # Can't hit a 128-multiple within budget (e.g. H=48): fall back to as wide as
        # fits.  Stores become masked — perf-only.
        r = max(1, max_hp // h)
    return r, r * h


def fuse_up_projection_params(w_cp, b_cp, w_p, b_p, *, compute_dtype=jnp.float32):
    """Fuse both Conv2D stages into one matmul; build block-diagonal packed weight.

    Call once at module init / parameter-update time and reuse across forward calls.
    w_cp: (K, C, C), b_cp: (K, C), w_p: (C, K, K), b_p: (C, K).
    """
    c, k = w_p.shape[0], w_p.shape[1]
    h = c * k
    w_cp32 = w_cp.astype(jnp.float32)
    w_p32 = w_p.astype(jnp.float32)
    w_fused = jnp.einsum("kij,jkm->ikjm", w_cp32, w_p32).reshape(h, h)
    b_fused = (
        jnp.einsum("kj,jkm->jm", b_cp.astype(jnp.float32), w_p32).reshape(h)
        + b_p.astype(jnp.float32).reshape(h)
    )

    r, hp = _choose_pack(h, compute_dtype)
    if r > 1:
        w_big = jnp.einsum(
            "rs,pq->rpsq", jnp.eye(r, dtype=jnp.float32), w_fused
        ).reshape(hp, hp)
        b_big = jnp.tile(b_fused, r)
    else:
        w_big, b_big = w_fused, b_fused

    return FusedUpProjection(
        w=w_big.astype(compute_dtype),
        b=b_big.reshape(1, hp).astype(jnp.float32),
        hidden_size=h,
        rows_per_pack=r,
    )


def _is_v5_class_device():
    try:
        return "v5" in jax.devices()[0].device_kind.lower()
    except Exception:  # pragma: no cover - defensive
        return False


def up_projection_apply(hidden_states, fused: FusedUpProjection, *, target_rows=None):
    """Run the fused up_projection kernel.  hidden_states: (..., H)."""
    h, r = fused.hidden_size, fused.rows_per_pack
    hp = fused.w.shape[0]
    compute_dtype = fused.w.dtype
    lead = hidden_states.shape[:-1]
    assert hidden_states.shape[-1] == h, (hidden_states.shape, h)
    n = int(math.prod(lead)) if lead else 1
    out_dtype = hidden_states.dtype

    x2 = hidden_states.reshape(n, h)
    if x2.dtype != compute_dtype:
        # TODO(synk): cast at the producer if bf16 flows end-to-end; this fallback is a
        # separate un-hidden pass over x.
        x2 = x2.astype(compute_dtype)

    # Pack R rows per lane-dense packed row.  When R | N this reshape is metadata-only;
    # otherwise pad only the tiny (< R rows) tail.
    tail = (-n) % r
    if tail:
        x2 = jnp.pad(x2, ((0, tail), (0, 0)))
    np0 = (n + tail) // r
    xp = x2.reshape(np0, hp)

    in_b = jnp.dtype(compute_dtype).itemsize
    out_b = jnp.dtype(out_dtype).itemsize
    w_b = in_b

    # ---- weight column tile: keep each weight block <= 2 MiB so big-H shapes don't
    # blow v7x's 64 MiB VMEM (for the module's small H there is a single column block,
    # DMA'd exactly once because the column axis is the outer grid axis). ----
    weight_block_budget = 2 << 20
    if hp * hp * w_b <= weight_block_budget:
        tj = hp
    else:
        tj = max(128, (weight_block_budget // (hp * w_b)) // 128 * 128)
    col_steps = pl.cdiv(hp, tj)
    # TODO(synk): for very large H (>~4k) with many column tiles, a contraction-tiled
    # variant with an f32 VMEM accumulator would avoid re-reading x per column tile.

    # ---- row tile from a VMEM byte budget (generation-aware), sublane quantum 16
    # (covers f32 / bf16), and >= ~8 grid steps when the data allows so the BlockSpec
    # pipeline has a steady state and both v7x TensorCores get >= 4 steps each. ----
    sub = 16
    act_budget = (12 << 20) if _is_v5_class_device() else (24 << 20)
    bytes_per_packed_row = 2 * hp * in_b + 2 * tj * out_b     # double-buffered x + out
    tn_cap = max(sub, (act_budget // bytes_per_packed_row) // sub * sub)
    if target_rows is not None:
        tn_cap = min(tn_cap, max(sub, target_rows // sub * sub))
    min_row_steps = 8
    tn_steps = -(-np0 // min_row_steps)
    tn_steps = -(-tn_steps // sub) * sub
    tn = min(tn_cap, tn_steps)
    if tn >= np0:
        tn = np0                      # single full-extent block (always legal)
    row_steps = pl.cdiv(np0, tn)      # ragged last block handled by Pallas

    # Useful work only (no padded / block-diagonal inflation) — scheduler hint.
    cost = pl.CostEstimate(
        flops=2 * n * h * h,
        transcendentals=0,
        bytes_accessed=n * h * (in_b + out_b) + hp * hp * w_b + hp * 4,
    )

    outp = pl.pallas_call(
        _fused_up_proj_kernel,
        out_shape=jax.ShapeDtypeStruct((np0, hp), out_dtype),
        grid_spec=pl.GridSpec(
            grid=(col_steps, row_steps),
            in_specs=[
                pl.BlockSpec((tn, hp), lambda j, i: (i, 0)),
                pl.BlockSpec((hp, tj), lambda j, i: (0, j)),
                pl.BlockSpec((1, tj), lambda j, i: (0, j)),
            ],
            out_specs=pl.BlockSpec((tn, tj), lambda j, i: (i, j)),
        ),
        compiler_params=pltpu.CompilerParams(
            dimension_semantics=("parallel", "parallel"),
            vmem_limit_bytes=32 * 1024 * 1024,
        ),
        cost_estimate=cost,
    )(xp, fused.w, fused.b)

    out = outp.reshape(np0 * r, h)
    if tail:
        out = out[:n]
    return out.reshape(*lead, h)


def up_projection_pallas(hidden_states, w_cp, b_cp, w_p, b_p, *, target_rows=None):
    """One-shot convenience wrapper (fuses weights per call; prefer caching the fused
    params via fuse_up_projection_params + up_projection_apply in real use)."""
    compute_dtype = (
        jnp.bfloat16 if hidden_states.dtype == jnp.bfloat16 else jnp.float32
    )
    fused = fuse_up_projection_params(w_cp, b_cp, w_p, b_p, compute_dtype=compute_dtype)
    return up_projection_apply(hidden_states, fused, target_rows=target_rows)


def up_projection_reference(hidden_states, w_cp, b_cp, w_p, b_p):
    """Pure-JAX transcription of the PyTorch forward, for verification."""
    c, k = w_p.shape[0], w_p.shape[1]
    lead = hidden_states.shape[:-1]
    n = int(math.prod(lead)) if lead else 1
    x3 = hidden_states.reshape(n, c, k)
    # Conv2D(transpose=True): out[n, j, k] = sum_i x3[n, i, k] * Wcp[k, i, j] + bcp[k, j]
    y1 = jnp.einsum("nik,kij->njk", x3, w_cp) + jnp.transpose(b_cp)[None]
    # Conv2D(transpose=False): out[n, j, :] = y1[n, j, :] @ Wp[j] + bp[j]
    y2 = jnp.einsum("njk,jkm->njm", y1, w_p) + b_p[None]
    return y2.reshape(*lead, c * k)


if __name__ == "__main__":
    key = jax.random.PRNGKey(0)
    k_proj, k_x, k_x2, k_x3 = jax.random.split(key, 4)

    # Small config consistent with up_projection's asserts.
    channel_dim = 8                  # K
    hidden_size = 32                 # H  -> num_channels C = 4
    d_large = 16                     # projection_matrix rows (multiple of K, >= K)
    signal_index = 8                 # multiple of K -> signal_head_start = 1
    store_index = 0                  # multiple of K -> store_head_start = 0

    C = hidden_size // channel_dim
    K = channel_dim
    num_useful = d_large // K
    signal_head_start = signal_index // K
    store_head_start = store_index // K
    assert num_useful + store_head_start <= C

    projection_matrix = jax.random.normal(k_proj, (d_large, K), jnp.float32)
    hidden_states = jax.random.normal(k_x, (2, 8, hidden_size), jnp.float32)

    # Deterministic parameter construction, exactly as up_projection.__init__:
    # channel_projection (transpose=True): weight (K, C, C) zeros, then the signal row
    # fans out to the store channels; bias (K, C) zeros.
    w_cp = (
        jnp.zeros((K, C, C), jnp.float32)
        .at[:, signal_head_start, store_head_start : store_head_start + num_useful]
        .set(1.0)
    )
    b_cp = jnp.zeros((K, C), jnp.float32)
    # projection (transpose=False): weight[i] = c_proj_init[i].T; bias (C, K) zeros.
    c_proj_init = jnp.zeros((C, K, K), jnp.float32)
    for t in range(num_useful):
        c_proj_init = c_proj_init.at[store_head_start + t].set(
            projection_matrix[t * K : (t + 1) * K, :]
        )
    w_p = jnp.swapaxes(c_proj_init, -1, -2)
    b_p = jnp.zeros((C, K), jnp.float32)

    # Fuse once (hoisted out of the per-call path) and reuse for every forward.
    fused = fuse_up_projection_params(w_cp, b_cp, w_p, b_p, compute_dtype=jnp.float32)

    # Case 1: tiny shape (single tile path, N divisible by R).
    out = up_projection_apply(hidden_states, fused)
    out = jax.block_until_ready(out)
    ref = up_projection_reference(hidden_states, w_cp, b_cp, w_p, b_p)
    assert out.shape == hidden_states.shape, (out.shape, hidden_states.shape)
    assert jnp.allclose(out, ref, atol=1e-5, rtol=1e-5), "Pallas result mismatch (small)"

    # Case 2: larger row count, tiny forced tile -> multi-step grid with a ragged last
    # row block (no full-array padding, no output slice on this path).
    hidden_states2 = jax.random.normal(k_x2, (4, 100, hidden_size), jnp.float32)
    out2 = up_projection_apply(hidden_states2, fused, target_rows=16)
    out2 = jax.block_until_ready(out2)
    ref2 = up_projection_reference(hidden_states2, w_cp, b_cp, w_p, b_p)
    assert out2.shape == hidden_states2.shape, (out2.shape, hidden_states2.shape)
    assert jnp.allclose(out2, ref2, atol=1e-5, rtol=1e-5), "Pallas result mismatch (tiled)"

    # Case 3: N not divisible by the pack factor R -> tiny tail padding path.
    hidden_states3 = jax.random.normal(k_x3, (3, 7, hidden_size), jnp.float32)
    out3 = up_projection_apply(hidden_states3, fused)
    out3 = jax.block_until_ready(out3)
    ref3 = up_projection_reference(hidden_states3, w_cp, b_cp, w_p, b_p)
    assert out3.shape == hidden_states3.shape, (out3.shape, hidden_states3.shape)
    assert jnp.allclose(out3, ref3, atol=1e-5, rtol=1e-5), "Pallas result mismatch (tail)"

    # One-shot convenience wrapper still works.
    out4 = jax.block_until_ready(
        up_projection_pallas(hidden_states, w_cp, b_cp, w_p, b_p)
    )
    assert jnp.allclose(out4, ref, atol=1e-5, rtol=1e-5), "Pallas result mismatch (wrap)"

    print("KERNEL_OK")
</pallas_src>

<mosaic_0001>
module attributes {stable_mosaic.version = 11 : i64} {
  func.func @_fused_up_proj_kernel(%arg0: i32, %arg1: i32, %arg2: memref<2x256xf32, #tpu.memory_space<vmem>>, %arg3: memref<256x256xf32, #tpu.memory_space<vmem>>, %arg4: memref<1x256xf32, #tpu.memory_space<vmem>>, %arg5: memref<2x256xf32, #tpu.memory_space<vmem>>) attributes {dimension_semantics = [#tpu.dimension_semantics<parallel>, #tpu.dimension_semantics<parallel>], iteration_bounds = array<i64: 1, 1>, scalar_prefetch = 0 : i64, scratch_operands = 0 : i64, tpu.core_type = #tpu.core_type<tc>, window_params = [{transform_indices = @transform_0, window_bounds = array<i64: 2, 256>}, {transform_indices = @transform_1, window_bounds = array<i64: 256, 256>}, {transform_indices = @transform_2, window_bounds = array<i64: 1, 256>}, {transform_indices = @transform_3, window_bounds = array<i64: 2, 256>}]} {
    %c0 = arith.constant 0 : index
    %c0_0 = arith.constant 0 : index
    %0 = vector.load %arg2[%c0, %c0_0] : memref<2x256xf32, #tpu.memory_space<vmem>>, vector<2x256xf32>
    %c0_1 = arith.constant 0 : index
    %c0_2 = arith.constant 0 : index
    %1 = vector.load %arg3[%c0_1, %c0_2] : memref<256x256xf32, #tpu.memory_space<vmem>>, vector<256x256xf32>
    %cst = arith.constant dense<0.000000e+00> : vector<2x256xf32>
    %2 = tpu.matmul %0, %1, %cst {dimension_numbers = #tpu.dot_dimension_numbers<[1], [0], [0], [1], [0, 0, 1, 1], [], []>} : vector<2x256xf32>, vector<256x256xf32>, vector<2x256xf32> -> vector<2x256xf32>
    %c0_3 = arith.constant 0 : index
    %c0_4 = arith.constant 0 : index
    %3 = vector.load %arg4[%c0_3, %c0_4] : memref<1x256xf32, #tpu.memory_space<vmem>>, vector<1x256xf32>
    %4 = vector.broadcast %3 : vector<1x256xf32> to vector<2x256xf32>
    %5 = arith.addf %2, %4 : vector<2x256xf32>
    %c0_5 = arith.constant 0 : index
    %c0_6 = arith.constant 0 : index
    %6 = vector.load %arg5[%c0_5, %c0_6] : memref<2x256xf32, #tpu.memory_space<vmem>>, vector<2x256xf32>
    tpu.vector_store %arg5[%c0_5, %c0_6], %5 {strides = array<i32>} : memref<2x256xf32, #tpu.memory_space<vmem>>, vector<2x256xf32>,
    return
  }
  func.func @transform_0(%arg0: i32, %arg1: i32) -> (i32, i32) {
    %c0_i32 = arith.constant 0 : i32
    %c0_i32_0 = arith.constant 0 : i32
    return %arg1, %c0_i32 : i32, i32
  }
  func.func @transform_1(%arg0: i32, %arg1: i32) -> (i32, i32) {
    %c0_i32 = arith.constant 0 : i32
    %c0_i32_0 = arith.constant 0 : i32
    return %c0_i32, %arg0 : i32, i32
  }
  func.func @transform_2(%arg0: i32, %arg1: i32) -> (i32, i32) {
    %c0_i32 = arith.constant 0 : i32
    %c0_i32_0 = arith.constant 0 : i32
    return %c0_i32, %arg0 : i32, i32
  }
  func.func @transform_3(%arg0: i32, %arg1: i32) -> (i32, i32) {
    %c0_i32 = arith.constant 0 : i32
    return %arg1, %arg0 : i32, i32
  }
}

</mosaic_0001>

<bundles_post_ra>
// kernel: tpu_custom_call.1
= control target key start
LH: loop header
LB: loop body
LE: loop exit
PB: predicated region body
PF: predicated region fallthrough
CT: control target
= control target key end

     0   :  { %8 = vsyncpa [#allocation3], 0  ;;  %s343_s0 = inlined_call_operand.hbm [shape: f32[2,256], index: 0, kind: input, shape index: {}]   ;;  %s344_s1 = inlined_call_operand.hbm [shape: f32[256,256], index: 1, kind: input, shape index: {}]   ;;  %s345_s2 = inlined_call_operand.vmem [shape: f32[1,256], index: 2, kind: input, shape index: {}]   ;;  %s346_s3 = inlined_call_operand.hbm [shape: f32[2,256], index: 3, kind: output, shape index: {}]  }
   0x1   :  { %9 = vsyncpa [#allocation6], 0 }
   0x2   :  { %10 = vsyncpa [#allocation4], 0  ;;  %s301_s12 = smov [#allocation2]   ;;  %s302_s14 = smov [#allocation5]  }
   0x3   :  { %s17_s13 = sshll.u32 %s301_s12, 4  ;;  %s26_s15 = sshll.u32 %s302_s14, 4  ;;  %s18_s13 = int_to_ptr.vmem [resolvable:$true] %s17_s13  ;;  %s27_s15 = int_to_ptr.vmem [resolvable:$true] %s26_s15 }
   0x4   :  { %s243_s16 = scalar_lea.vmem %s18_s13, 64  ;;  %p248_p1 = scmp.lt.s32.totalorder %s18_s13, %s18_s13 }
   0x5   :  { %p244_p0 = scmp.ne.s32.totalorder %s18_s13, %s243_s16  ;;  %p249_p2 = scmp.lt.s32.totalorder %s243_s16, %s243_s16 }
   0x7   :  { %p250_p3 = por %p249_p2, %p248_p1 }
   0x9   :  { %p251_p4 = pnand %p250_p3, %p244_p0 }
   0xb   :  { %254 = shalt.err (!%p251_p4)
}
   0xc   :  { %20 = dma.hbm_to_vmem [thread:$0]  %s343_s0, 64, %s18_s13, [#allocation3]  }
   0xd   :  { %s263_s19 = scalar_lea.vmem %s27_s15, 8192  ;;  %p268_p6 = scmp.lt.s32.totalorder %s27_s15, %s27_s15 }
   0xe   :  { %p264_p5 = scmp.ne.s32.totalorder %s27_s15, %s263_s19  ;;  %p269_p7 = scmp.lt.s32.totalorder %s263_s19, %s263_s19 }
  0x10   :  { %p270_p8 = por %p269_p7, %p268_p6 }
  0x12   :  { %p271_p9 = pnand %p270_p8, %p264_p5 }
  0x14   :  { %274 = shalt.err (!%p271_p9)
}
  0x15   :  { %s303_s20 = smov 256   ;;  %s304_s21 = smov 16  }
  0x16   :  { %32 = dma.hbm_to_vmem [thread:$0]  %s344_s1, 8192, %s27_s15, [#allocation6], %s303_s20, %s303_s20, %s304_s21  }
  0x17   :  { %295 = dma.done.wait [#allocation3], 64  }
  0x18   :  { %296 = vsyncadd [#allocation3], 4294967232 }
  0x19   :  { %297 = dma.done.wait [#allocation6], 8192  }
  0x1a   :  { %298 = vsyncadd [#allocation6], 4294959104  ;;  %v73_v0 = vld [vmem:[#allocation5 + $0xf8] sm:$0xff]  ;;  %v72_v1 = vld [vmem:[#allocation5 + $0xf0] sm:$0xff]  ;;  %s305_s24 = smov [#allocation7]  }
  0x1b   :  { %v71_v2 = vld [vmem:[#allocation5 + $0xe8] sm:$0xff]  ;;  %129 = vmatprep.subr.mxu0 %v73_v0  ;;  %v70_v3 = vld [vmem:[#allocation5 + $0xe0] sm:$0xff]  ;;  %v69_v4 = vld [vmem:[#allocation5 + $0xd8] sm:$0xff]  ;;  %s218_s25 = sshll.u32 %s305_s24, 4  ;;  %s219_s25 = int_to_ptr.vmem [resolvable:$true] %s218_s25 }
  0x1c   :  { %130 = vmatpush1.msra.mxu0 %v72_v1  ;;  %v68_v5 = vld [vmem:[#allocation5 + $0xd0] sm:$0xff]  ;;  %v67_v6 = vld [vmem:[#allocation5 + $0xc8] sm:$0xff]  ;;  %v66_v7 = vld [vmem:[#allocation5 + $0xc0] sm:$0xff]  ;;  %s275_s26 = scalar_lea.vmem %s219_s25, 64  ;;  %p280_p11 = scmp.lt.s32.totalorder %s219_s25, %s219_s25 }
  0x1d   :  { %131 = vmatprep.subr.mxu0 %v71_v2  ;;  %v65_v8 = vld [vmem:[#allocation5 + $0xb8] sm:$0xff]  ;;  %v64_v9 = vld [vmem:[#allocation5 + $0xb0] sm:$0xff]  ;;  %v63_v10 = vld [vmem:[#allocation5 + $0xa8] sm:$0xff]  ;;  %v108_v2 = vlaneseq  ;;  %p276_p10 = scmp.ne.s32.totalorder %s219_s25, %s275_s26  ;;  %p281_p12 = scmp.lt.s32.totalorder %s275_s26, %s275_s26 }
  0x1e   :  { %132 = vmatpush1.msra.mxu0 %v70_v3  ;;  %v62_v11 = vld [vmem:[#allocation5 + $0xa0] sm:$0xff]  ;;  %v61_v12 = vld [vmem:[#allocation5 + $0x98] sm:$0xff]  ;;  %v60_v13 = vld [vmem:[#allocation5 + $0x90] sm:$0xff] }
  0x1f   :  { %133 = vmatprep.subr.mxu0 %v69_v4  ;;  %v59_v14 = vld [vmem:[#allocation5 + $0x88] sm:$0xff]  ;;  %v58_v15 = vld [vmem:[#allocation5 + $0x80] sm:$0xff]  ;;  %v57_v16 = vld [vmem:[#allocation5 + $0x78] sm:$0xff]  ;;  %v109_v3 = vshrl.u32 %v108_v2, 7  ;;  %p282_p13 = por %p281_p12, %p280_p11 }
  0x20   :  { %134 = vmatpush1.msra.mxu0 %v68_v5  ;;  %v56_v17 = vld [vmem:[#allocation5 + $0x70] sm:$0xff]  ;;  %v55_v18 = vld [vmem:[#allocation5 + $0x68] sm:$0xff]  ;;  %v54_v19 = vld [vmem:[#allocation5 + $0x60] sm:$0xff] }
  0x21   :  { %135 = vmatprep.subr.mxu0 %v67_v6  ;;  %v53_v20 = vld [vmem:[#allocation5 + $0x58] sm:$0xff]  ;;  %v52_v21 = vld [vmem:[#allocation5 + $0x50] sm:$0xff]  ;;  %v51_v22 = vld [vmem:[#allocation5 + $0x48] sm:$0xff]  ;;  %v110_v4 = vsub.s32 0, %v109_v3  ;;  %v114_v5 = vsub.s32 1, %v109_v3  ;;  %p283_p0 = pnand %p282_p13, %p276_p10 }
  0x22   :  { %136 = vmatpush1.msra.mxu0 %v66_v7  ;;  %v50_v23 = vld [vmem:[#allocation5 + $0x40] sm:$0xff]  ;;  %v332_v24 = vld.sshfl [vmem:[#allocation2] sm:$0x33 pattern:$0x76325410]  ;;  %v48_v27 = vld [vmem:[#allocation5 + $0x30] sm:$0xff] }
  0x23   :  { %137 = vmatprep.subr.mxu0 %v65_v8  ;;  %v49_v25 = vld [vmem:[#allocation5 + $0x38] sm:$0xff]  ;;  %v126_v26 = vcombine.high %v332_v24, %v332_v24  ;;  %v47_v28 = vld [vmem:[#allocation5 + $0x28] sm:$0xff]  ;;  %v46_v29 = vld [vmem:[#allocation5 + $0x20] sm:$0xff] }
  0x24   :  { %138 = vmatpush1.msra.mxu0 %v64_v9  ;;  %v45_v30 = vld [vmem:[#allocation5 + $0x18] sm:$0xff]  ;;  %v44_v31 = vld [vmem:[#allocation5 + $0x10] sm:$0xff]  ;;  %v43_v32 = vld [vmem:[#allocation5 + $0x8] sm:$0xff] }
  0x25   :  { %139 = vmatprep.subr.mxu0 %v63_v10  ;;  %193 = vmatprep.mubr.f32.mxu0 %v126_v26  ;;  %v42_v33 = vld [vmem:[#allocation5] sm:$0xff]  ;;  %v105_v34 = vld [vmem:[#allocation5 + $0x1f8] sm:$0xff]  ;;  %v104_v35 = vld [vmem:[#allocation5 + $0x1f0] sm:$0xff] }
  0x26   :  { %140 = vmatpush1.msra.mxu0 %v62_v11  ;;  %v103_v36 = vld [vmem:[#allocation5 + $0x1e8] sm:$0xff]  ;;  %v102_v37 = vld [vmem:[#allocation5 + $0x1e0] sm:$0xff]  ;;  %v101_v38 = vld [vmem:[#allocation5 + $0x1d8] sm:$0xff] }
  0x27   :  { %141 = vmatprep.subr.mxu0 %v61_v12  ;;  %v100_v39 = vld [vmem:[#allocation5 + $0x1d0] sm:$0xff]  ;;  %v99_v40 = vld [vmem:[#allocation5 + $0x1c8] sm:$0xff]  ;;  %v98_v41 = vld [vmem:[#allocation5 + $0x1c0] sm:$0xff] }
  0x28   :  { %142 = vmatpush1.msra.mxu0 %v60_v13  ;;  %v97_v42 = vld [vmem:[#allocation5 + $0x1b8] sm:$0xff]  ;;  %v96_v43 = vld [vmem:[#allocation5 + $0x1b0] sm:$0xff]  ;;  %v95_v44 = vld [vmem:[#allocation5 + $0x1a8] sm:$0xff] }
  0x29   :  { %143 = vmatprep.subr.mxu0 %v59_v14  ;;  %v94_v45 = vld [vmem:[#allocation5 + $0x1a0] sm:$0xff]  ;;  %v93_v46 = vld [vmem:[#allocation5 + $0x198] sm:$0xff]  ;;  %v92_v47 = vld [vmem:[#allocation5 + $0x190] sm:$0xff] }
  0x2a   :  { %144 = vmatpush1.msra.mxu0 %v58_v15  ;;  %v91_v48 = vld [vmem:[#allocation5 + $0x188] sm:$0xff]  ;;  %v90_v49 = vld [vmem:[#allocation5 + $0x180] sm:$0xff]  ;;  %v89_v50 = vld [vmem:[#allocation5 + $0x178] sm:$0xff] }
  0x2b   :  { %145 = vmatprep.subr.mxu0 %v57_v16  ;;  %v88_v51 = vld [vmem:[#allocation5 + $0x170] sm:$0xff]  ;;  %v87_v52 = vld [vmem:[#allocation5 + $0x168] sm:$0xff]  ;;  %v86_v53 = vld [vmem:[#allocation5 + $0x160] sm:$0xff] }
  0x2c   :  { %146 = vmatpush1.msra.mxu0 %v56_v17  ;;  %v85_v54 = vld [vmem:[#allocation5 + $0x158] sm:$0xff]  ;;  %v84_v55 = vld [vmem:[#allocation5 + $0x150] sm:$0xff]  ;;  %v83_v56 = vld [vmem:[#allocation5 + $0x148] sm:$0xff] }
  0x2d   :  { %147 = vmatprep.subr.mxu0 %v55_v18  ;;  %v82_v57 = vld [vmem:[#allocation5 + $0x140] sm:$0xff]  ;;  %v81_v58 = vld [vmem:[#allocation5 + $0x138] sm:$0xff]  ;;  %v80_v59 = vld [vmem:[#allocation5 + $0x130] sm:$0xff] }
  0x2e   :  { %148 = vmatpush1.msra.mxu0 %v54_v19  ;;  %v79_v60 = vld [vmem:[#allocation5 + $0x128] sm:$0xff]  ;;  %v78_v61 = vld [vmem:[#allocation5 + $0x120] sm:$0xff]  ;;  %v77_v62 = vld [vmem:[#allocation5 + $0x118] sm:$0xff] }
  0x2f   :  { %149 = vmatprep.subr.mxu0 %v53_v20  ;;  %v76_v63 = vld [vmem:[#allocation5 + $0x110] sm:$0xff]  ;;  %v75_v0 = vld [vmem:[#allocation5 + $0x108] sm:$0xff]  ;;  %v74_v1 = vld [vmem:[#allocation5 + $0x100] sm:$0xff] }
  0x30   :  { %150 = vmatpush1.msra.mxu0 %v52_v21  ;;  %v106_v6 = vld [vmem:[%s345_s2] sm:$0x3] }
  0x31   :  { %151 = vmatprep.subr.mxu0 %v51_v22  ;;  %v111_v7 = vrot.slane %v106_v6, %v110_v4  ;;  %v115_v8 = vrot.slane %v106_v6, %v114_v5 }
  0x32   :  { %152 = vmatpush1.msra.mxu0 %v50_v23 }
  0x33   :  { %153 = vmatprep.subr.mxu0 %v49_v25 }
  0x34   :  { %154 = vmatpush1.msra.mxu0 %v48_v27 }
  0x35   :  { %155 = vmatprep.subr.mxu0 %v47_v28 }
  0x36   :  { %156 = vmatpush1.msra.mxu0 %v46_v29 }
  0x37   :  { %157 = vmatprep.subr.mxu0 %v45_v30 }
  0x38   :  { %158 = vmatpush1.msra.mxu0 %v44_v31 }
  0x39   :  { %159 = vmatprep.subr.mxu0 %v43_v32 }
  0x3a   :  { %160 = vmatpush1.msra.mxu0 %v42_v33 }
  0x3b   :  { %161 = vmatprep.subr.mxu0 %v105_v34 }
  0x3c   :  { %162 = vmatpush2.msra.mxu0 %v104_v35 }
  0x3d   :  { %163 = vmatprep.subr.mxu0 %v103_v36 }
  0x3e   :  { %164 = vmatpush2.msra.mxu0 %v102_v37 }
  0x3f   :  { %165 = vmatprep.subr.mxu0 %v101_v38 }
  0x40   :  { %166 = vmatpush2.msra.mxu0 %v100_v39 }
  0x41   :  { %167 = vmatprep.subr.mxu0 %v99_v40 }
  0x42   :  { %168 = vmatpush2.msra.mxu0 %v98_v41 }
  0x43   :  { %169 = vmatprep.subr.mxu0 %v97_v42 }
  0x44   :  { %170 = vmatpush2.msra.mxu0 %v96_v43 }
  0x45   :  { %171 = vmatprep.subr.mxu0 %v95_v44 }
  0x46   :  { %172 = vmatpush2.msra.mxu0 %v94_v45 }
  0x47   :  { %173 = vmatprep.subr.mxu0 %v93_v46 }
  0x48   :  { %174 = vmatpush2.msra.mxu0 %v92_v47 }
  0x49   :  { %175 = vmatprep.subr.mxu0 %v91_v48 }
  0x4a   :  { %176 = vmatpush2.msra.mxu0 %v90_v49 }
  0x4b   :  { %177 = vmatprep.subr.mxu0 %v89_v50 }
  0x4c   :  { %178 = vmatpush2.msra.mxu0 %v88_v51 }
  0x4d   :  { %179 = vmatprep.subr.mxu0 %v87_v52 }
  0x4e   :  { %180 = vmatpush2.msra.mxu0 %v86_v53 }
  0x4f   :  { %181 = vmatprep.subr.mxu0 %v85_v54 }
  0x50   :  { %182 = vmatpush2.msra.mxu0 %v84_v55 }
  0x51   :  { %183 = vmatprep.subr.mxu0 %v83_v56 }
  0x52   :  { %184 = vmatpush2.msra.mxu0 %v82_v57 }
  0x53   :  { %185 = vmatprep.subr.mxu0 %v81_v58 }
  0x54   :  { %186 = vmatpush2.msra.mxu0 %v80_v59 }
  0x55   :  { %187 = vmatprep.subr.mxu0 %v79_v60 }
  0x56   :  { %188 = vmatpush2.msra.mxu0 %v78_v61 }
  0x57   :  { %189 = vmatprep.subr.mxu0 %v77_v62 }
  0x58   :  { %190 = vmatpush2.msra.mxu0 %v76_v63 }
  0x59   :  { %191 = vmatprep.subr.mxu0 %v75_v0 }
  0x5a   :  { %192 = vmatpush2.msra.mxu0 %v74_v1 }
  0x5b   :  { %194 = vmatmul.mubr.f32.vlgmr.msra.gmra.mxu0 %v332_v24 }
 0x11b   :  { %v195_v9 = vpop.f32.mrf.mxu0 }
 0x11c   :  { %v196_v11 = vadd.f32 %v195_v9, %v111_v7 }
 0x11d   :  { %v197_v10 = vpop.f32.mrf.mxu0 }
 0x11e   :  { %v198_v12 = vadd.f32 %v197_v10, %v115_v8 }
 0x120   :  { %v202_v13 = vcombine.low %v196_v11, %v198_v12 }
 0x122   :  { %229 = vst.sshfl [vmem:[#allocation7] sm:$0x33 pattern:$0x76325410] %v202_v13 }
 0x123   :  { %286 = shalt.err (!%p283_p0)
}
 0x124   :  { %221 = dma.vmem_to_hbm [thread:$0]  %s219_s25, 64, %s346_s3, [#allocation4]  }
 0x125   :  { %299 = dma.done.wait [#allocation4], 64  }
 0x126   :  { %300 = vsyncadd [#allocation4], 4294967232 }
 0x127   :  { %225 = vsyncpa [#allocation3], 1 }
 0x128   :  { %226 = vsyncpa [#allocation6], 1 }
 0x129   :  { %227 = vsyncpa [#allocation4], 1 }

</bundles_post_ra>
